<compile_context>
chip_gen: v5e
topology: v5e:2x2
jax: 0.10.0
libtpu: 0.0.40
codegen_flags: <defaults>
</compile_context>

<pallas_src>
import jax
import jax.numpy as jnp
from jax import lax
from jax.experimental import pallas as pl
from jax.experimental.pallas import tpu as pltpu

# ---- problem sizes (small, consistent with Policy: obs slice 18:27 -> 9) ----
ACT_DIM = 3
OBS_DIM = 9
D = ACT_DIM + OBS_DIM          # input_dim = act_dim + obs_dim = 12
T = 8                          # horizon
HIDDEN = 32
SAMPLING_STEPS = 4
BATCH = 2


# ------------------------------ fused kernel ---------------------------------
def _fused_sampling_kernel(x_ref, cond_ref, w1_ref, w2_ref, hid_ref, outp_ref,
                           out_ref):
    """All SAMPLING_STEPS flow steps + finalize in a single kernel.

    Per step (matches Policy.step with inpaint, algo='flow'):
        x = inpaint(x); x = x + dt * model(x, t_i, data)
    Finalize:
        x = inpaint(x); x = clip(x, -1, 1); x = x * out_scale + out_offset
    """
    BT, Dd = x_ref.shape                    # (B*T, D), flat token layout
    B = cond_ref.shape[0] // 2              # cond rows: [obs_0..obs_{B-1}, goal_0..]
    Tt = BT // B
    H = w1_ref.shape[1]

    x = x_ref[...]                          # (BT, D) f32, stays in vregs

    # ---- loop-invariant: inpaint mask + merged replacement tensor ----------
    # original: x[:, 0, ACT_DIM:] = obs ; x[:, -1, ACT_DIM:] = goal
    row = lax.broadcasted_iota(jnp.int32, (BT, Dd), 0)
    col = lax.broadcasted_iota(jnp.int32, (BT, Dd), 1)
    seq_pos = lax.rem(row, Tt)
    feat = col >= ACT_DIM
    is_first = seq_pos == 0
    is_last = seq_pos == Tt - 1
    mask = (is_first | is_last) & feat

    cond = cond_ref[...]                    # (2B, D): obs rows then goal rows
    # Build repl with per-batch sublane broadcasts (no gather, no reshape).
    # Values outside `mask` are never selected, so the init is don't-care.
    repl = jnp.broadcast_to(cond[0:1, :], (BT, Dd))
    for b in range(B):
        in_b = (row >= b * Tt) & (row < (b + 1) * Tt)
        obs_b = jnp.broadcast_to(cond[b:b + 1, :], (BT, Dd))
        goal_b = jnp.broadcast_to(cond[B + b:B + b + 1, :], (BT, Dd))
        repl = jnp.where(in_b & is_first, obs_b, repl)
        repl = jnp.where(in_b & is_last, goal_b, repl)

    # ---- loop-invariant: weights / biases (bf16 operands for the MXU) ------
    w1 = w1_ref[...].astype(jnp.bfloat16)   # (D, H)
    w2 = w2_ref[...].astype(jnp.bfloat16)   # (H, D)
    base = hid_ref[0:1, :]                  # (1, H)  = b1 + returns * wr (returns == 1)
    wt = hid_ref[1:2, :]                    # (1, H)  time-embedding weight
    b2 = outp_ref[0:1, :]                   # (1, D)
    out_scale = outp_ref[1:2, :]            # (1, D)
    out_offset = outp_ref[2:3, :]           # (1, D)

    # timesteps = linspace(0, 1, S+1)  =>  compile-time constants
    dt = 1.0 / SAMPLING_STEPS

    for i in range(SAMPLING_STEPS):         # trace-time unrolled
        t_i = i * dt                        # Python float constant
        x = jnp.where(mask, repl, x)        # inpaint
        # ---- model(x, t_i, data): token-wise MLP, flat 2-D MXU dots --------
        h = jnp.dot(x.astype(jnp.bfloat16), w1,
                    preferred_element_type=jnp.float32)            # (BT, H)
        h = jnp.maximum(h + (base + t_i * wt), 0.0)
        v = jnp.dot(h.astype(jnp.bfloat16), w2,
                    preferred_element_type=jnp.float32) + b2        # (BT, D)
        x = x + dt * v                      # Euler update (f32)

    # ---- finalize: last inpaint + normalizer.clip + inverse_scale_output ---
    x = jnp.where(mask, repl, x)
    x = jnp.clip(x, -1.0, 1.0)
    out_ref[...] = x * out_scale + out_offset


# --------------------------- pallas wrapper ----------------------------------
_VMEM = pl.BlockSpec(memory_space=pltpu.MemorySpace.VMEM)


def fused_sampling(x_flat, cond, w1, w2, hid_params, out_params):
    return pl.pallas_call(
        _fused_sampling_kernel,
        out_shape=jax.ShapeDtypeStruct(x_flat.shape, jnp.float32),
        in_specs=[_VMEM] * 6,
        out_specs=_VMEM,
    )(x_flat, cond, w1, w2, hid_params, out_params)


# ------------------------------ policy glue ----------------------------------
def make_params():
    """Deterministic synthetic model + normalizer parameters (built once)."""
    kp = jax.random.PRNGKey(42)
    k1, k2, k3, k4 = jax.random.split(kp, 4)
    w1 = 0.1 * jax.random.normal(k1, (D, HIDDEN), jnp.float32)
    b1 = jnp.zeros((1, HIDDEN), jnp.float32)
    wt = 0.1 * jax.random.normal(k2, (1, HIDDEN), jnp.float32)   # time embed
    wr = 0.1 * jax.random.normal(k3, (1, HIDDEN), jnp.float32)   # return cond
    w2 = 0.1 * jax.random.normal(k4, (HIDDEN, D), jnp.float32)
    b2 = jnp.zeros((1, D), jnp.float32)
    model_params = (w1, b1, wt, wr, w2, b2)

    # synthetic normalizer (affine)
    in_scale = 0.5 * jnp.ones((OBS_DIM,), jnp.float32)
    in_offset = 0.1 * jnp.ones((OBS_DIM,), jnp.float32)
    out_scale = 2.0 * jnp.ones((1, D), jnp.float32)
    out_offset = 0.05 * jnp.ones((1, D), jnp.float32)
    return model_params, (in_scale, in_offset, out_scale, out_offset)


@jax.jit
def classifier_policy_forward(obs, goal, x_key, model_params, norm_params):
    """JAX equivalent of ClassifierPolicy.forward on processed data."""
    in_scale, in_offset, out_scale, out_offset = norm_params
    w1, b1, wt, wr, w2, b2 = model_params
    bsz = obs.shape[0]

    # Policy.process (inference branch): scale obs/goal; returns = ones(B, 1).
    obs_s = (obs - in_offset) * in_scale
    goal_s = (goal - in_offset) * in_scale

    # Stack conditioning and zero-pad the action slots once: (2B, D).
    cond = jnp.concatenate([obs_s, goal_s], axis=0)          # (2B, OBS_DIM)
    cond = jnp.pad(cond, ((0, 0), (ACT_DIM, 0)))             # (2B, D)

    # returns == 1 at inference -> fold return-conditioning weight into bias.
    hid_params = jnp.concatenate([b1 + wr, wt], axis=0)      # (2, H)
    out_params = jnp.concatenate([b2, out_scale, out_offset], axis=0)  # (3, D)

    # x ~ N(0, 1), flat token layout (B*T, D).
    x0 = jax.random.normal(x_key, (bsz * T, D), jnp.float32)

    # One fused kernel: all sampling steps + finalize.
    out_flat = fused_sampling(x0, cond, w1, w2, hid_params, out_params)
    return out_flat.reshape(bsz, T, D)


if __name__ == "__main__":
    key = jax.random.PRNGKey(0)
    k_obs, k_goal, k_x = jax.random.split(key, 3)
    obs = jax.random.normal(k_obs, (BATCH, OBS_DIM), jnp.float32)
    goal = jax.random.normal(k_goal, (BATCH, OBS_DIM), jnp.float32)

    model_params, norm_params = make_params()
    out = classifier_policy_forward(obs, goal, k_x, model_params, norm_params)
    jax.block_until_ready(out)
    assert out.shape == (BATCH, T, D)
    assert bool(jnp.all(jnp.isfinite(out)))
    print("KERNEL_OK")
</pallas_src>

<mosaic_0001>
module attributes {stable_mosaic.version = 11 : i64} {
  func.func @_fused_sampling_kernel(%arg0: memref<16x12xf32, #tpu.memory_space<vmem>>, %arg1: memref<4x12xf32, #tpu.memory_space<vmem>>, %arg2: memref<12x32xf32, #tpu.memory_space<vmem>>, %arg3: memref<32x12xf32, #tpu.memory_space<vmem>>, %arg4: memref<2x32xf32, #tpu.memory_space<vmem>>, %arg5: memref<3x12xf32, #tpu.memory_space<vmem>>, %arg6: memref<16x12xf32, #tpu.memory_space<vmem>>) attributes {dimension_semantics = [], scalar_prefetch = 0 : i64, scratch_operands = 0 : i64, tpu.core_type = #tpu.core_type<tc>} {
    %c0 = arith.constant 0 : index
    %c0_0 = arith.constant 0 : index
    %0 = vector.load %arg0[%c0, %c0_0] : memref<16x12xf32, #tpu.memory_space<vmem>>, vector<16x12xf32>
    %1 = tpu.iota {dimensions = array<i32: 0>} : vector<16x12xi32>
    %2 = tpu.iota {dimensions = array<i32: 1>} : vector<16x12xi32>
    %c8_i32 = arith.constant 8 : i32
    %3 = vector.broadcast %c8_i32 : i32 to vector<16x12xi32>
    %4 = arith.remsi %1, %3 : vector<16x12xi32>
    %c3_i32 = arith.constant 3 : i32
    %5 = vector.broadcast %c3_i32 : i32 to vector<16x12xi32>
    %6 = arith.cmpi sge, %2, %5 : vector<16x12xi32>
    %c0_i32 = arith.constant 0 : i32
    %7 = vector.broadcast %c0_i32 : i32 to vector<16x12xi32>
    %8 = arith.cmpi eq, %4, %7 : vector<16x12xi32>
    %c7_i32 = arith.constant 7 : i32
    %9 = vector.broadcast %c7_i32 : i32 to vector<16x12xi32>
    %10 = arith.cmpi eq, %4, %9 : vector<16x12xi32>
    %11 = arith.ori %8, %10 : vector<16x12xi1>
    %12 = arith.andi %11, %6 : vector<16x12xi1>
    %c0_1 = arith.constant 0 : index
    %c0_2 = arith.constant 0 : index
    %13 = vector.load %arg1[%c0_1, %c0_2] : memref<4x12xf32, #tpu.memory_space<vmem>>, vector<4x12xf32>
    %14 = vector.extract_strided_slice %13 {offsets = [0, 0], sizes = [1, 12], strides = [1, 1]} : vector<4x12xf32> to vector<1x12xf32>
    %15 = vector.shape_cast %14 : vector<1x12xf32> to vector<1x12xf32>
    %16 = vector.broadcast %15 : vector<1x12xf32> to vector<16x12xf32>
    %c0_i32_3 = arith.constant 0 : i32
    %17 = vector.broadcast %c0_i32_3 : i32 to vector<16x12xi32>
    %18 = arith.cmpi sge, %1, %17 : vector<16x12xi32>
    %c8_i32_4 = arith.constant 8 : i32
    %19 = vector.broadcast %c8_i32_4 : i32 to vector<16x12xi32>
    %20 = arith.cmpi slt, %1, %19 : vector<16x12xi32>
    %21 = arith.andi %18, %20 : vector<16x12xi1>
    %22 = vector.extract_strided_slice %13 {offsets = [0, 0], sizes = [1, 12], strides = [1, 1]} : vector<4x12xf32> to vector<1x12xf32>
    %23 = vector.shape_cast %22 : vector<1x12xf32> to vector<1x12xf32>
    %24 = vector.broadcast %23 : vector<1x12xf32> to vector<16x12xf32>
    %25 = vector.extract_strided_slice %13 {offsets = [2, 0], sizes = [1, 12], strides = [1, 1]} : vector<4x12xf32> to vector<1x12xf32>
    %26 = vector.shape_cast %25 : vector<1x12xf32> to vector<1x12xf32>
    %27 = vector.broadcast %26 : vector<1x12xf32> to vector<16x12xf32>
    %28 = arith.andi %21, %8 : vector<16x12xi1>
    %29 = arith.select %28, %24, %16 : vector<16x12xi1>, vector<16x12xf32>
    %30 = arith.andi %21, %10 : vector<16x12xi1>
    %31 = arith.select %30, %27, %29 : vector<16x12xi1>, vector<16x12xf32>
    %c8_i32_5 = arith.constant 8 : i32
    %32 = vector.broadcast %c8_i32_5 : i32 to vector<16x12xi32>
    %33 = arith.cmpi sge, %1, %32 : vector<16x12xi32>
    %c16_i32 = arith.constant 16 : i32
    %34 = vector.broadcast %c16_i32 : i32 to vector<16x12xi32>
    %35 = arith.cmpi slt, %1, %34 : vector<16x12xi32>
    %36 = arith.andi %33, %35 : vector<16x12xi1>
    %37 = vector.extract_strided_slice %13 {offsets = [1, 0], sizes = [1, 12], strides = [1, 1]} : vector<4x12xf32> to vector<1x12xf32>
    %38 = vector.shape_cast %37 : vector<1x12xf32> to vector<1x12xf32>
    %39 = vector.broadcast %38 : vector<1x12xf32> to vector<16x12xf32>
    %40 = vector.extract_strided_slice %13 {offsets = [3, 0], sizes = [1, 12], strides = [1, 1]} : vector<4x12xf32> to vector<1x12xf32>
    %41 = vector.shape_cast %40 : vector<1x12xf32> to vector<1x12xf32>
    %42 = vector.broadcast %41 : vector<1x12xf32> to vector<16x12xf32>
    %43 = arith.andi %36, %8 : vector<16x12xi1>
    %44 = arith.select %43, %39, %31 : vector<16x12xi1>, vector<16x12xf32>
    %45 = arith.andi %36, %10 : vector<16x12xi1>
    %46 = arith.select %45, %42, %44 : vector<16x12xi1>, vector<16x12xf32>
    %c0_6 = arith.constant 0 : index
    %c0_7 = arith.constant 0 : index
    %47 = vector.load %arg2[%c0_6, %c0_7] : memref<12x32xf32, #tpu.memory_space<vmem>>, vector<12x32xf32>
    %48 = arith.truncf %47 : vector<12x32xf32> to vector<12x32xbf16>
    %c0_8 = arith.constant 0 : index
    %c0_9 = arith.constant 0 : index
    %49 = vector.load %arg3[%c0_8, %c0_9] : memref<32x12xf32, #tpu.memory_space<vmem>>, vector<32x12xf32>
    %50 = arith.truncf %49 : vector<32x12xf32> to vector<32x12xbf16>
    %c0_10 = arith.constant 0 : index
    %c0_11 = arith.constant 0 : index
    %51 = vector.load %arg4[%c0_10, %c0_11] : memref<2x32xf32, #tpu.memory_space<vmem>>, vector<1x32xf32>
    %c1 = arith.constant 1 : index
    %c0_12 = arith.constant 0 : index
    %52 = vector.load %arg4[%c1, %c0_12] : memref<2x32xf32, #tpu.memory_space<vmem>>, vector<1x32xf32>
    %c0_13 = arith.constant 0 : index
    %c0_14 = arith.constant 0 : index
    %53 = vector.load %arg5[%c0_13, %c0_14] : memref<3x12xf32, #tpu.memory_space<vmem>>, vector<1x12xf32>
    %c1_15 = arith.constant 1 : index
    %c0_16 = arith.constant 0 : index
    %54 = vector.load %arg5[%c1_15, %c0_16] : memref<3x12xf32, #tpu.memory_space<vmem>>, vector<1x12xf32>
    %c2 = arith.constant 2 : index
    %c0_17 = arith.constant 0 : index
    %55 = vector.load %arg5[%c2, %c0_17] : memref<3x12xf32, #tpu.memory_space<vmem>>, vector<1x12xf32>
    %56 = arith.select %12, %46, %0 : vector<16x12xi1>, vector<16x12xf32>
    %57 = arith.truncf %56 : vector<16x12xf32> to vector<16x12xbf16>
    %cst = arith.constant dense<0.000000e+00> : vector<16x32xf32>
    %58 = tpu.matmul %57, %48, %cst {dimension_numbers = #tpu.dot_dimension_numbers<[1], [0], [0], [1], [0, 0, 1, 1], [], []>} : vector<16x12xbf16>, vector<12x32xbf16>, vector<16x32xf32> -> vector<16x32xf32>
    %cst_18 = arith.constant 0.000000e+00 : f32
    %59 = vector.broadcast %cst_18 : f32 to vector<1x32xf32>
    %60 = arith.mulf %59, %52 : vector<1x32xf32>
    %61 = arith.addf %51, %60 : vector<1x32xf32>
    %62 = vector.broadcast %61 : vector<1x32xf32> to vector<16x32xf32>
    %63 = arith.addf %58, %62 : vector<16x32xf32>
    %cst_19 = arith.constant 0.000000e+00 : f32
    %64 = vector.broadcast %cst_19 : f32 to vector<16x32xf32>
    %65 = arith.maximumf %63, %64 : vector<16x32xf32>
    %66 = arith.truncf %65 : vector<16x32xf32> to vector<16x32xbf16>
    %cst_20 = arith.constant dense<0.000000e+00> : vector<16x12xf32>
    %67 = tpu.matmul %66, %50, %cst_20 {dimension_numbers = #tpu.dot_dimension_numbers<[1], [0], [0], [1], [0, 0, 1, 1], [], []>} : vector<16x32xbf16>, vector<32x12xbf16>, vector<16x12xf32> -> vector<16x12xf32>
    %68 = vector.broadcast %53 : vector<1x12xf32> to vector<16x12xf32>
    %69 = arith.addf %67, %68 : vector<16x12xf32>
    %cst_21 = arith.constant 2.500000e-01 : f32
    %70 = vector.broadcast %cst_21 : f32 to vector<16x12xf32>
    %71 = arith.mulf %70, %69 : vector<16x12xf32>
    %72 = arith.addf %56, %71 : vector<16x12xf32>
    %73 = arith.select %12, %46, %72 : vector<16x12xi1>, vector<16x12xf32>
    %74 = arith.truncf %73 : vector<16x12xf32> to vector<16x12xbf16>
    %cst_22 = arith.constant dense<0.000000e+00> : vector<16x32xf32>
    %75 = tpu.matmul %74, %48, %cst_22 {dimension_numbers = #tpu.dot_dimension_numbers<[1], [0], [0], [1], [0, 0, 1, 1], [], []>} : vector<16x12xbf16>, vector<12x32xbf16>, vector<16x32xf32> -> vector<16x32xf32>
    %cst_23 = arith.constant 2.500000e-01 : f32
    %76 = vector.broadcast %cst_23 : f32 to vector<1x32xf32>
    %77 = arith.mulf %76, %52 : vector<1x32xf32>
    %78 = arith.addf %51, %77 : vector<1x32xf32>
    %79 = vector.broadcast %78 : vector<1x32xf32> to vector<16x32xf32>
    %80 = arith.addf %75, %79 : vector<16x32xf32>
    %cst_24 = arith.constant 0.000000e+00 : f32
    %81 = vector.broadcast %cst_24 : f32 to vector<16x32xf32>
    %82 = arith.maximumf %80, %81 : vector<16x32xf32>
    %83 = arith.truncf %82 : vector<16x32xf32> to vector<16x32xbf16>
    %cst_25 = arith.constant dense<0.000000e+00> : vector<16x12xf32>
    %84 = tpu.matmul %83, %50, %cst_25 {dimension_numbers = #tpu.dot_dimension_numbers<[1], [0], [0], [1], [0, 0, 1, 1], [], []>} : vector<16x32xbf16>, vector<32x12xbf16>, vector<16x12xf32> -> vector<16x12xf32>
    %85 = vector.broadcast %53 : vector<1x12xf32> to vector<16x12xf32>
    %86 = arith.addf %84, %85 : vector<16x12xf32>
    %cst_26 = arith.constant 2.500000e-01 : f32
    %87 = vector.broadcast %cst_26 : f32 to vector<16x12xf32>
    %88 = arith.mulf %87, %86 : vector<16x12xf32>
    %89 = arith.addf %73, %88 : vector<16x12xf32>
    %90 = arith.select %12, %46, %89 : vector<16x12xi1>, vector<16x12xf32>
    %91 = arith.truncf %90 : vector<16x12xf32> to vector<16x12xbf16>
    %cst_27 = arith.constant dense<0.000000e+00> : vector<16x32xf32>
    %92 = tpu.matmul %91, %48, %cst_27 {dimension_numbers = #tpu.dot_dimension_numbers<[1], [0], [0], [1], [0, 0, 1, 1], [], []>} : vector<16x12xbf16>, vector<12x32xbf16>, vector<16x32xf32> -> vector<16x32xf32>
    %cst_28 = arith.constant 5.000000e-01 : f32
    %93 = vector.broadcast %cst_28 : f32 to vector<1x32xf32>
    %94 = arith.mulf %93, %52 : vector<1x32xf32>
    %95 = arith.addf %51, %94 : vector<1x32xf32>
    %96 = vector.broadcast %95 : vector<1x32xf32> to vector<16x32xf32>
    %97 = arith.addf %92, %96 : vector<16x32xf32>
    %cst_29 = arith.constant 0.000000e+00 : f32
    %98 = vector.broadcast %cst_29 : f32 to vector<16x32xf32>
    %99 = arith.maximumf %97, %98 : vector<16x32xf32>
    %100 = arith.truncf %99 : vector<16x32xf32> to vector<16x32xbf16>
    %cst_30 = arith.constant dense<0.000000e+00> : vector<16x12xf32>
    %101 = tpu.matmul %100, %50, %cst_30 {dimension_numbers = #tpu.dot_dimension_numbers<[1], [0], [0], [1], [0, 0, 1, 1], [], []>} : vector<16x32xbf16>, vector<32x12xbf16>, vector<16x12xf32> -> vector<16x12xf32>
    %102 = vector.broadcast %53 : vector<1x12xf32> to vector<16x12xf32>
    %103 = arith.addf %101, %102 : vector<16x12xf32>
    %cst_31 = arith.constant 2.500000e-01 : f32
    %104 = vector.broadcast %cst_31 : f32 to vector<16x12xf32>
    %105 = arith.mulf %104, %103 : vector<16x12xf32>
    %106 = arith.addf %90, %105 : vector<16x12xf32>
    %107 = arith.select %12, %46, %106 : vector<16x12xi1>, vector<16x12xf32>
    %108 = arith.truncf %107 : vector<16x12xf32> to vector<16x12xbf16>
    %cst_32 = arith.constant dense<0.000000e+00> : vector<16x32xf32>
    %109 = tpu.matmul %108, %48, %cst_32 {dimension_numbers = #tpu.dot_dimension_numbers<[1], [0], [0], [1], [0, 0, 1, 1], [], []>} : vector<16x12xbf16>, vector<12x32xbf16>, vector<16x32xf32> -> vector<16x32xf32>
    %cst_33 = arith.constant 7.500000e-01 : f32
    %110 = vector.broadcast %cst_33 : f32 to vector<1x32xf32>
    %111 = arith.mulf %110, %52 : vector<1x32xf32>
    %112 = arith.addf %51, %111 : vector<1x32xf32>
    %113 = vector.broadcast %112 : vector<1x32xf32> to vector<16x32xf32>
    %114 = arith.addf %109, %113 : vector<16x32xf32>
    %cst_34 = arith.constant 0.000000e+00 : f32
    %115 = vector.broadcast %cst_34 : f32 to vector<16x32xf32>
    %116 = arith.maximumf %114, %115 : vector<16x32xf32>
    %117 = arith.truncf %116 : vector<16x32xf32> to vector<16x32xbf16>
    %cst_35 = arith.constant dense<0.000000e+00> : vector<16x12xf32>
    %118 = tpu.matmul %117, %50, %cst_35 {dimension_numbers = #tpu.dot_dimension_numbers<[1], [0], [0], [1], [0, 0, 1, 1], [], []>} : vector<16x32xbf16>, vector<32x12xbf16>, vector<16x12xf32> -> vector<16x12xf32>
    %119 = vector.broadcast %53 : vector<1x12xf32> to vector<16x12xf32>
    %120 = arith.addf %118, %119 : vector<16x12xf32>
    %cst_36 = arith.constant 2.500000e-01 : f32
    %121 = vector.broadcast %cst_36 : f32 to vector<16x12xf32>
    %122 = arith.mulf %121, %120 : vector<16x12xf32>
    %123 = arith.addf %107, %122 : vector<16x12xf32>
    %124 = arith.select %12, %46, %123 : vector<16x12xi1>, vector<16x12xf32>
    %cst_37 = arith.constant -1.000000e+00 : f32
    %cst_38 = arith.constant 1.000000e+00 : f32
    %125 = vector.broadcast %cst_37 : f32 to vector<16x12xf32>
    %126 = arith.maximumf %125, %124 : vector<16x12xf32>
    %127 = vector.broadcast %cst_38 : f32 to vector<16x12xf32>
    %128 = arith.minimumf %127, %126 : vector<16x12xf32>
    %129 = vector.broadcast %54 : vector<1x12xf32> to vector<16x12xf32>
    %130 = arith.mulf %128, %129 : vector<16x12xf32>
    %131 = vector.broadcast %55 : vector<1x12xf32> to vector<16x12xf32>
    %132 = arith.addf %130, %131 : vector<16x12xf32>
    %c0_39 = arith.constant 0 : index
    %c0_40 = arith.constant 0 : index
    %133 = vector.load %arg6[%c0_39, %c0_40] : memref<16x12xf32, #tpu.memory_space<vmem>>, vector<16x12xf32>
    tpu.vector_store %arg6[%c0_39, %c0_40], %132 {strides = array<i32>} : memref<16x12xf32, #tpu.memory_space<vmem>>, vector<16x12xf32>,
    return
  }
}

</mosaic_0001>

<bundles_post_ra>
// kernel: classifier_policy_forward.1
= control target key start
LH: loop header
LB: loop body
LE: loop exit
PB: predicated region body
PF: predicated region fallthrough
CT: control target
= control target key end

     0   :  { %vm108_vm0 = vcmask 1045504   ;;  %v27_v2 = vlaneseq  ;;  %s526_s0 = inlined_call_operand.vmem [shape: f32[16,12], index: 0, kind: input, shape index: {}]   ;;  %s527_s1 = inlined_call_operand.vmem [shape: f32[4,12], index: 1, kind: input, shape index: {}]   ;;  %s528_s2 = inlined_call_operand.vmem [shape: f32[12,32], index: 2, kind: input, shape index: {}]   ;;  %s529_s3 = inlined_call_operand.vmem [shape: f32[32,12], index: 3, kind: input, shape index: {}]   ;;  %s530_s4 = inlined_call_operand.vmem [shape: f32[2,32], index: 4, kind: input, shape index: {}]   ;;  %s531_s5 = inlined_call_operand.vmem [shape: f32[3,12], index: 5, kind: input, shape index: {}]   ;;  %s532_s6 = inlined_call_operand.hbm [shape: f32[16,12], index: 6, kind: output, shape index: {}]  }
   0x1   :  { %v84_v0 = vld [vmem:[%s528_s2] sm:$0xff]  ;;  %v85_v1 = vld [vmem:[%s528_s2 + $0x8] sm:$0xf] }
   0x2   :  { %v86_v3 = vpack.c.bf16 %v85_v1, %v84_v0  ;;  %v55_v4 = vld [vmem:[%s527_s1] sm:$0xf]  ;;  %v28_v5 = vshrl.u32 %v27_v2, 7  ;;  %v31_v6 = vand.u32 127, %v27_v2 }
   0x3   :  { %v56_v8 = vperm.slane %v55_v4, 0  ;;  %v63_v9 = vperm.slane %v55_v4, 2  ;;  %v74_v12 = vperm.slane %v55_v4, 1 }
   0x4   :  { %v110_v7 = vsel %vm108_vm0, %v86_v3, 0  ;;  %v29_v10 = vadd.s32 8, %v28_v5  ;;  %v36_v11 = vand.u32 7, %v28_v5  ;;  %vm46_vm1 = vcmp.ge.s32.totalorder %v31_v6, 3 }
   0x5   :  { %119 = vmatpush.bf16.msra.mxu0 %v110_v7  ;;  %168 = vmatpush.bf16.msra.mxu2 %v110_v7 }
   0x9   :  { %215 = vmatpush.bf16.msrb.mxu0 %v110_v7 }
   0xa   :  { %11 = vsyncpa [#allocation3], 0  ;;  %v25_v13 = vld [vmem:[%s526_s0] sm:$0xff]  ;;  %v43_v14 = vand.u32 7, %v29_v10  ;;  %vm47_vm2 = vcmp.eq.s32.totalorder %v36_v11, 0  ;;  %vm49_vm3 = vcmp.eq.s32.totalorder %v36_v11, 7 }
   0xb   :  { %v75_v15 = vperm.slane %v55_v4, 3  ;;  %vm51_vm4 = vmor %vm47_vm2, %vm49_vm3  ;;  %v417_v16 = vsel %vm49_vm3, %v63_v9, %v56_v8  ;;  %v26_v17 = vld [vmem:[%s526_s0 + $0x8] sm:$0xff]  ;;  %vm104_vm10 = vcmask 97280   ;;  %v89_v25 = vld [vmem:[%s529_s3 + $0x10] sm:$0xff]  ;;  %vm130_vm11 = vcmask 261120   ;;  %s367_s20 = smov [#allocation2]  }
   0xc   :  { %vm48_vm5 = vcmp.eq.s32.totalorder %v43_v14, 0  ;;  %vm50_vm6 = vcmp.eq.s32.totalorder %v43_v14, 7  ;;  %vm423_vm7 = vmand %vm51_vm4, %vm46_vm1  ;;  %v90_v26 = vld [vmem:[%s529_s3 + $0x18] sm:$0xff]  ;;  %v87_v28 = vld [vmem:[%s529_s3] sm:$0xff]  ;;  %s311_s21 = sshll.u32 %s367_s20, 4  ;;  %s368_s24 = smov 128   ;;  %s312_s21 = int_to_ptr.vmem [resolvable:$true] %s311_s21 }
   0xd   :  { %vm52_vm8 = vmor %vm48_vm5, %vm50_vm6  ;;  %v79_v19 = vsel %vm48_vm5, %v74_v12, %v56_v8  ;;  %v98_v20 = vsel %vm423_vm7, %v417_v16, %v25_v13  ;;  %v92_v27 = vpack.c.bf16 %v90_v26, %v89_v25  ;;  %v88_v29 = vld [vmem:[%s529_s3 + $0x8] sm:$0xff]  ;;  %v456_v31 = vld [vmem:[%s530_s4 + $0x1] sm:$0x1]  ;;  %s369_s25 = smov 8  }
   0xe   :  { %vm431_vm9 = vmand %vm52_vm8, %vm46_vm1  ;;  %v435_v22 = vsel %vm50_vm6, %v75_v15, %v79_v19  ;;  %v91_v30 = vpack.c.bf16 %v88_v29, %v87_v28  ;;  %v101_v32 = vmul.f32 0.0, %v456_v31  ;;  %v462_v33 = vld [vmem:[%s530_s4] sm:$0x1]  ;;  %v155_v55 = vmul.f32 0.25, %v456_v31 }
   0xf   :  { %v99_v23 = vsel %vm431_vm9, %v435_v22, %v26_v17  ;;  %140 = vmatpush.bf16.msra.mxu1 %v92_v27  ;;  %187 = vmatpush.bf16.msra.mxu3 %v92_v27  ;;  %v469_v43 = vld [vmem:[%s531_s5] ss:$0 sm:$0xff]  ;;  %v202_v12 = vmul.f32 0.5, %v456_v31 }
  0x10   :  { %v100_v24 = vpack.c.bf16 %v99_v23, %v98_v20  ;;  %234 = vmatpush.bf16.msrb.mxu2 %v92_v27  ;;  %v102_v34 = vadd.f32 %v101_v32, %v462_v33  ;;  %v156_v56 = vadd.f32 %v155_v55, %v462_v33  ;;  %v340_v55 = vld [vmem:[%s531_s5 + $0x2] ss:$0 sm:$0xff] }
  0x11   :  { %v203_v13 = vadd.f32 %v202_v12, %v462_v33 }
  0x12   :  { %325 = vmatmul.msk.bf16.vlgmr.msra.gmra.mxu0 %vm104_vm10, %v100_v24  ;;  %v103_v36 = vperm.slane %v102_v34, 0  ;;  %v157_v58 = vperm.slane %v156_v56, 0 }
  0x13   :  { %141 = vmatpush.bf16.msra.mxu1 %v91_v30  ;;  %188 = vmatpush.bf16.msra.mxu3 %v91_v30  ;;  %v204_v15 = vperm.slane %v203_v13, 0 }
  0x14   :  { %235 = vmatpush.bf16.msrb.mxu2 %v91_v30 }
  0x17   :  { %262 = vmatpush.bf16.msrb.mxu1 %v110_v7  ;;  %281 = vmatpush.bf16.msrb.mxu3 %v92_v27 }
  0x1b   :  { %282 = vmatpush.bf16.msrb.mxu3 %v91_v30 }
  0x8f   :  { %v121_v35 = vpop.f32.mrf.mxu0 }
  0x90   :  { %v122_v37 = vadd.f32 %v121_v35, %v103_v36 }
  0x92   :  { %v126_v40 = vmax.f32 %v122_v37, 0.0 }
  0x97   :  { %v123_v38 = vpop.f32.mrf.mxu0 }
  0x98   :  { %v124_v39 = vadd.f32 %v123_v38, %v103_v36 }
  0x9a   :  { %v127_v41 = vmax.f32 %v124_v39, 0.0  ;;  %v249_v39 = vmul.f32 0.75, %v456_v31  ;;  %v339_v31 = vld [vmem:[%s531_s5 + $0x1] ss:$0 sm:$0xff]  ;;  %s313_s5 = sshll.u32 %s532_s6, 4  ;;  %s314_s5 = int_to_ptr.hbm [resolvable:$true] %s313_s5 }
  0x9c   :  { %v128_v42 = vpack.c.bf16 %v127_v41, %v126_v40  ;;  %v250_v40 = vadd.f32 %v249_v39, %v462_v33 }
  0x9e   :  { %326 = vmatmul.msk.bf16.vlgmr.msra.gmra.mxu1 %vm130_vm11, %v128_v42  ;;  %v251_v42 = vperm.slane %v250_v40, 0 }
 0x11b   :  { %v143_v44 = vpop.f32.mrf.mxu1 }
 0x11c   :  { %v144_v45 = vadd.f32 %v469_v43, %v143_v44 }
 0x11e   :  { %v148_v46 = vmul.f32 0.25, %v144_v45 }
 0x120   :  { %v150_v49 = vadd.f32 %v148_v46, %v98_v20 }
 0x122   :  { %v152_v52 = vsel %vm423_vm7, %v417_v16, %v150_v49 }
 0x123   :  { %v145_v47 = vpop.f32.mrf.mxu1 }
 0x124   :  { %v146_v48 = vadd.f32 %v469_v43, %v145_v47 }
 0x126   :  { %v149_v50 = vmul.f32 0.25, %v146_v48 }
 0x128   :  { %v151_v51 = vadd.f32 %v149_v50, %v99_v23 }
 0x12a   :  { %v153_v53 = vsel %vm431_vm9, %v435_v22, %v151_v51 }
 0x12b   :  { %v154_v54 = vpack.c.bf16 %v153_v53, %v152_v52 }
 0x12d   :  { %327 = vmatmul.msk.bf16.vlgmr.msra.gmra.mxu2 %vm104_vm10, %v154_v54 }
 0x1b0   :  { %v170_v57 = vpop.f32.mrf.mxu2 }
 0x1b1   :  { %v171_v59 = vadd.f32 %v170_v57, %v157_v58 }
 0x1b3   :  { %v175_v62 = vmax.f32 %v171_v59, 0.0 }
 0x1b8   :  { %v172_v60 = vpop.f32.mrf.mxu2 }
 0x1b9   :  { %v173_v61 = vadd.f32 %v172_v60, %v157_v58 }
 0x1bb   :  { %v176_v63 = vmax.f32 %v173_v61, 0.0 }
 0x1bd   :  { %v177_v0 = vpack.c.bf16 %v176_v63, %v175_v62 }
 0x1bf   :  { %328 = vmatmul.msk.bf16.vlgmr.msra.gmra.mxu3 %vm130_vm11, %v177_v0 }
 0x242   :  { %v190_v1 = vpop.f32.mrf.mxu3 }
 0x243   :  { %v191_v2 = vadd.f32 %v469_v43, %v190_v1 }
 0x245   :  { %v195_v3 = vmul.f32 0.25, %v191_v2 }
 0x247   :  { %v197_v6 = vadd.f32 %v195_v3, %v152_v52 }
 0x249   :  { %v199_v9 = vsel %vm423_vm7, %v417_v16, %v197_v6 }
 0x24a   :  { %v192_v4 = vpop.f32.mrf.mxu3 }
 0x24b   :  { %v193_v5 = vadd.f32 %v469_v43, %v192_v4 }
 0x24d   :  { %v196_v7 = vmul.f32 0.25, %v193_v5 }
 0x24f   :  { %v198_v8 = vadd.f32 %v196_v7, %v153_v53 }
 0x251   :  { %v200_v10 = vsel %vm431_vm9, %v435_v22, %v198_v8 }
 0x252   :  { %v201_v11 = vpack.c.bf16 %v200_v10, %v199_v9 }
 0x254   :  { %329 = vmatmul.msk.bf16.vlgmr.msrb.gmra.mxu0 %vm104_vm10, %v201_v11 }
 0x2d1   :  { %v217_v14 = vpop.f32.mrf.mxu0 }
 0x2d2   :  { %v218_v17 = vadd.f32 %v217_v14, %v204_v15 }
 0x2d4   :  { %v222_v23 = vmax.f32 %v218_v17, 0.0 }
 0x2d9   :  { %v219_v19 = vpop.f32.mrf.mxu0 }
 0x2da   :  { %v220_v20 = vadd.f32 %v219_v19, %v204_v15 }
 0x2dc   :  { %v223_v24 = vmax.f32 %v220_v20, 0.0 }
 0x2de   :  { %v224_v25 = vpack.c.bf16 %v223_v24, %v222_v23 }
 0x2e0   :  { %330 = vmatmul.msk.bf16.vlgmr.msrb.gmra.mxu2 %vm130_vm11, %v224_v25 }
 0x363   :  { %v237_v26 = vpop.f32.mrf.mxu2 }
 0x364   :  { %v238_v27 = vadd.f32 %v469_v43, %v237_v26 }
 0x366   :  { %v242_v28 = vmul.f32 0.25, %v238_v27 }
 0x368   :  { %v244_v32 = vadd.f32 %v242_v28, %v199_v9 }
 0x36a   :  { %v246_v36 = vsel %vm423_vm7, %v417_v16, %v244_v32 }
 0x36b   :  { %v239_v29 = vpop.f32.mrf.mxu2 }
 0x36c   :  { %v240_v30 = vadd.f32 %v469_v43, %v239_v29 }
 0x36e   :  { %v243_v34 = vmul.f32 0.25, %v240_v30 }
 0x370   :  { %v245_v35 = vadd.f32 %v243_v34, %v200_v10 }
 0x372   :  { %v247_v37 = vsel %vm431_vm9, %v435_v22, %v245_v35 }
 0x373   :  { %v248_v38 = vpack.c.bf16 %v247_v37, %v246_v36 }
 0x375   :  { %331 = vmatmul.msk.bf16.vlgmr.msrb.gmra.mxu1 %vm104_vm10, %v248_v38 }
 0x3f2   :  { %v264_v41 = vpop.f32.mrf.mxu1 }
 0x3f3   :  { %v265_v44 = vadd.f32 %v264_v41, %v251_v42 }
 0x3f5   :  { %v269_v47 = vmax.f32 %v265_v44, 0.0 }
 0x3fa   :  { %v266_v45 = vpop.f32.mrf.mxu1 }
 0x3fb   :  { %v267_v46 = vadd.f32 %v266_v45, %v251_v42 }
 0x3fd   :  { %v270_v48 = vmax.f32 %v267_v46, 0.0 }
 0x3ff   :  { %v271_v49 = vpack.c.bf16 %v270_v48, %v269_v47 }
 0x401   :  { %332 = vmatmul.msk.bf16.vlgmr.msrb.gmra.mxu3 %vm130_vm11, %v271_v49 }
 0x484   :  { %v284_v50 = vpop.f32.mrf.mxu3 }
 0x485   :  { %v285_v51 = vadd.f32 %v469_v43, %v284_v50 }
 0x487   :  { %v289_v52 = vmul.f32 0.25, %v285_v51 }
 0x489   :  { %v291_v53 = vadd.f32 %v289_v52, %v246_v36 }
 0x48b   :  { %v293_v33 = vsel %vm423_vm7, %v417_v16, %v291_v53 }
 0x48c   :  { %v333_v54 = vclamps-f32 %v293_v33, 1.0  ;;  %v286_v56 = vpop.f32.mrf.mxu3 }
 0x48d   :  { %v287_v57 = vadd.f32 %v469_v43, %v286_v56 }
 0x48e   :  { %v300_v58 = vmul.f32 %v339_v31, %v333_v54 }
 0x48f   :  { %v290_v59 = vmul.f32 0.25, %v287_v57 }
 0x490   :  { %v303_v60 = vadd.f32 %v340_v55, %v300_v58 }
 0x491   :  { %v292_v61 = vadd.f32 %v290_v59, %v247_v37 }
 0x492   :  { %305 = vst.msk [vmem:[#allocation2] sm:$0xff] %vm104_vm10, %v303_v60 }
 0x493   :  { %v294_v62 = vsel %vm431_vm9, %v435_v22, %v292_v61 }
 0x494   :  { %v334_v18 = vclamps-f32 %v294_v62, 1.0 }
 0x496   :  { %v301_v16 = vmul.f32 %v339_v31, %v334_v18 }
 0x498   :  { %v304_v43 = vadd.f32 %v340_v55, %v301_v16 }
 0x49a   :  { %306 = vst.msk [vmem:[#allocation2 + $0x8] sm:$0xff] %vm104_vm10, %v304_v43 }
 0x49b   :  { %319 = dma.vmem_to_hbm [thread:$0]  %s312_s21, 256, %s314_s5, [#allocation3], %s368_s24, %s368_s24, %s369_s25  }
 0x49c   :  { %365 = dma.done.wait [#allocation3], 256  }
 0x49d   :  { %366 = vsyncadd [#allocation3], 4294967040 }
 0x49e   :  { %324 = vsyncpa [#allocation3], 1 }

</bundles_post_ra>
